<compile_context>
chip_gen: v7x
topology: tpu7x:2x2x1
jax: 0.10.0
libtpu: 0.0.40
codegen_flags: <defaults>
</compile_context>

<pallas_src>
import functools

import jax
import jax.numpy as jnp
from jax.experimental import pallas as pl
from jax.experimental.pallas import tpu as pltpu


def _fake_quant_kernel(x_ref, params_ref, o_ref, *, qmin, qmax):
    # params columns: 0 = scale, 1 = 1/scale (host-precomputed), 2 = zero_point
    x = x_ref[...].astype(jnp.float32)            # (row_tile, col_tile)
    p = params_ref[...]                           # (row_tile, 3) f32
    s = p[:, 0:1]                                 # (row_tile, 1) -> lane broadcast
    inv_s = p[:, 1:2]
    z = p[:, 2:3]
    q = jnp.round(x * inv_s - z)                  # jnp.round == half-to-even == torch.round
    q = jnp.clip(q, qmin, qmax)
    o_ref[...] = ((q + z) * s).astype(o_ref.dtype)


def _sublane_packing(dtype):
    # 8 for f32, 16 for bf16/f16, 32 for int8/fp8.
    return max(8, 32 // jnp.dtype(dtype).itemsize)


def _hw_config():
    """Per-generation (target_block_bytes, vmem_limit_bytes)."""
    try:
        kind = jax.devices()[0].device_kind.lower()
    except Exception:
        kind = ""
    if ("v5 lite" in kind) or ("v5e" in kind) or ("v5lite" in kind):
        # ~0.8 TB/s HBM: 2 MiB blocks already amortize the per-step overhead;
        # the explicit vmem limit is what lets them double-buffer (16 MiB default).
        return 2 * 1024 * 1024, 32 * 1024 * 1024
    if ("v7" in kind) or ("7x" in kind):
        # ~3.2 TB/s per TC but only 64 MiB physical VMEM: big blocks, capped limit.
        return 7 * 1024 * 1024, 48 * 1024 * 1024
    if "v6" in kind:
        # ~1.4 TB/s, 128 MiB VMEM.
        return 4 * 1024 * 1024, 48 * 1024 * 1024
    return 4 * 1024 * 1024, 32 * 1024 * 1024


def _choose_tiles(rows, cols, dtype, target_block_bytes):
    """Pick (row_tile, col_tile): (a) satisfy the tiling rules (dtype-aware sublane
    packing), (b) keep blocks ~target_block_bytes, (c) keep the lane axis as wide
    as possible (unmasked lane-dense stores), (d) keep >=2 parallel grid steps."""
    itemsize = jnp.dtype(dtype).itemsize
    packing = _sublane_packing(dtype)
    elem_budget = max(packing * 128, target_block_bytes // itemsize)

    # Lane (last) axis: whole rows whenever `packing` of them fit the budget;
    # otherwise a large 128-multiple chunk.
    if cols * packing <= elem_budget:
        col_tile = cols
    else:
        col_tile = min(cols, max(128, (elem_budget // packing) // 128 * 128))

    row_tile = min(rows, max(packing, elem_budget // max(col_tile, 1)))
    if row_tile < rows:
        # Round to the dtype's sublane packing (16 for bf16, 32 for int8) so
        # sub-32-bit loads/stores stay unmasked and lower cleanly.
        row_tile = max(packing, (row_tile // packing) * packing)

    def _grid(rt, ct):
        return pl.cdiv(rows, rt), pl.cdiv(cols, ct)

    # Megacore: guarantee >=2 parallel grid steps when the tensor is big enough,
    # so a 2-TensorCore chip (v7x) gets work on both cores.
    gr, gc = _grid(row_tile, col_tile)
    if gr * gc < 2 and rows >= 2 * packing:
        row_tile = max(packing, pl.cdiv(pl.cdiv(rows, 2), packing) * packing)
        gr, gc = _grid(row_tile, col_tile)

    # Avoid the worst small odd case (3 steps -> 2:1 imbalance on 2 TCs).
    if gc == 1 and gr == 3 and rows >= 4 * packing:
        row_tile = max(packing, (rows // 4) // packing * packing)

    return row_tile, col_tile


def quantizer_forward(x_nchw, scale_c, zero_point_c, *, bit=8,
                      quant_min_val=None, quant_max_val=None):
    """Fake-quantize NCHW input with channelwise_conv scale/zero_point buffers."""
    if bit == 32:
        return x_nchw

    N, C, H, W = x_nchw.shape
    rows, cols = N * C, H * W
    x2 = x_nchw.reshape(rows, cols)

    # Expand per-channel (C,1,1,1) buffers to per-row columns; pack
    # [scale, 1/scale, zero_point] into one (rows, 3) f32 array (one small DMA
    # per row-tile; reciprocal done once on host, not per grid step in-kernel).
    s_c = scale_c.reshape(C).astype(jnp.float32)
    z_c = zero_point_c.reshape(C).astype(jnp.float32)
    p_c = jnp.stack([s_c, 1.0 / s_c, z_c], axis=1)              # (C, 3)
    params = jnp.broadcast_to(p_c[None], (N, C, 3)).reshape(rows, 3)

    # quant_min_val / quant_max_val come from the Quantizer subclass; default
    # to the signed-symmetric range for `bit` bits when not provided.
    if quant_min_val is None:
        quant_min_val = float(-(2 ** (bit - 1)))
    if quant_max_val is None:
        quant_max_val = float(2 ** (bit - 1) - 1)

    target_block_bytes, vmem_limit = _hw_config()
    row_tile, col_tile = _choose_tiles(rows, cols, x2.dtype, target_block_bytes)
    grid = (pl.cdiv(rows, row_tile), pl.cdiv(cols, col_tile))

    out2 = pl.pallas_call(
        functools.partial(_fake_quant_kernel,
                          qmin=float(quant_min_val), qmax=float(quant_max_val)),
        out_shape=jax.ShapeDtypeStruct((rows, cols), x_nchw.dtype),
        grid_spec=pltpu.PrefetchScalarGridSpec(
            num_scalar_prefetch=0,
            grid=grid,
            in_specs=[
                pl.BlockSpec((row_tile, col_tile), lambda i, j: (i, j)),
                pl.BlockSpec((row_tile, 3), lambda i, j: (i, 0)),
            ],
            out_specs=pl.BlockSpec((row_tile, col_tile), lambda i, j: (i, j)),
        ),
        compiler_params=pltpu.CompilerParams(
            dimension_semantics=("parallel", "parallel"),
            vmem_limit_bytes=vmem_limit,
        ),
    )(x2, params)

    return out2.reshape(N, C, H, W)


def _reference_forward(x, scale_c, zp_c, bit):
    qmin = float(-(2 ** (bit - 1)))
    qmax = float(2 ** (bit - 1) - 1)
    s = scale_c.reshape(1, -1, 1, 1).astype(jnp.float32)
    z = zp_c.reshape(1, -1, 1, 1).astype(jnp.float32)
    q = jnp.clip(jnp.round(x / s - z), qmin, qmax)
    return (q + z) * s


if __name__ == "__main__":
    key = jax.random.PRNGKey(0)
    bit = 8

    # --- small NCHW case (matches the module's conv-activation use) ---------
    N, C, H, W = 2, 4, 16, 16
    x = jax.random.normal(key, (N, C, H, W), dtype=jnp.float32) * 2.0

    # Deterministic, non-trivial channelwise_conv buffers (shapes per __init__:
    # (C,1,1,1)). Power-of-two scales keep x*(1/s) == x/s bit-exact, so the
    # host-reciprocal kernel matches the literal PyTorch x/scale reference.
    scale = (0.25 * (0.5 ** jnp.arange(C, dtype=jnp.float32))).reshape(C, 1, 1, 1)
    zero_point = (jnp.arange(C, dtype=jnp.float32) % 3.0 - 1.0).reshape(C, 1, 1, 1)

    out = jax.block_until_ready(quantizer_forward(x, scale, zero_point, bit=bit))
    ref = _reference_forward(x, scale, zero_point, bit)
    assert out.shape == x.shape and out.dtype == x.dtype
    assert jnp.allclose(out, ref, atol=1e-6, rtol=1e-6)

    # --- bf16 activations path (bf16 in / bf16 out; f32 math in-kernel) -----
    x_bf16 = x.astype(jnp.bfloat16)
    out_bf16 = jax.block_until_ready(
        quantizer_forward(x_bf16, scale, zero_point, bit=bit))
    ref_bf16 = _reference_forward(x_bf16.astype(jnp.float32), scale, zero_point,
                                  bit).astype(jnp.bfloat16)
    assert out_bf16.dtype == jnp.bfloat16
    assert jnp.allclose(out_bf16.astype(jnp.float32),
                        ref_bf16.astype(jnp.float32), atol=1e-2, rtol=1e-2)

    # --- medium case that exercises the multi-step / megacore tiling path ---
    N2, C2, H2, W2 = 8, 32, 64, 64
    x_med = jax.random.normal(jax.random.PRNGKey(1), (N2, C2, H2, W2),
                              dtype=jnp.float32)
    scale2 = (0.25 * (0.5 ** (jnp.arange(C2, dtype=jnp.float32) % 6.0))
              ).reshape(C2, 1, 1, 1)
    zp2 = (jnp.arange(C2, dtype=jnp.float32) % 5.0 - 2.0).reshape(C2, 1, 1, 1)
    out_med = jax.block_until_ready(quantizer_forward(x_med, scale2, zp2, bit=bit))
    ref_med = _reference_forward(x_med, scale2, zp2, bit)
    assert jnp.allclose(out_med, ref_med, atol=1e-6, rtol=1e-6)

    # --- bit == 32 passthrough path ------------------------------------------
    out32 = jax.block_until_ready(quantizer_forward(x, scale, zero_point, bit=32))
    assert jnp.array_equal(out32, x)

    print("KERNEL_OK")
</pallas_src>

<mosaic_0001>
module attributes {stable_mosaic.version = 11 : i64} {
  func.func @_fake_quant_kernel(%arg0: i32, %arg1: i32, %arg2: memref<8x256xf32, #tpu.memory_space<vmem>>, %arg3: memref<8x3xf32, #tpu.memory_space<vmem>>, %arg4: memref<8x256xf32, #tpu.memory_space<vmem>>) attributes {dimension_semantics = [#tpu.dimension_semantics<parallel>, #tpu.dimension_semantics<parallel>], iteration_bounds = array<i64: 1, 1>, scalar_prefetch = 0 : i64, scratch_operands = 0 : i64, tpu.core_type = #tpu.core_type<tc>, window_params = [{transform_indices = @transform_0, window_bounds = array<i64: 8, 256>}, {transform_indices = @transform_1, window_bounds = array<i64: 8, 3>}, {transform_indices = @transform_2, window_bounds = array<i64: 8, 256>}]} {
    %c0 = arith.constant 0 : index
    %c0_0 = arith.constant 0 : index
    %0 = vector.load %arg2[%c0, %c0_0] : memref<8x256xf32, #tpu.memory_space<vmem>>, vector<8x256xf32>
    %c0_1 = arith.constant 0 : index
    %c0_2 = arith.constant 0 : index
    %1 = vector.load %arg3[%c0_1, %c0_2] : memref<8x3xf32, #tpu.memory_space<vmem>>, vector<8x3xf32>
    %2 = vector.extract_strided_slice %1 {offsets = [0, 0], sizes = [8, 1], strides = [1, 1]} : vector<8x3xf32> to vector<8x1xf32>
    %3 = vector.extract_strided_slice %1 {offsets = [0, 1], sizes = [8, 1], strides = [1, 1]} : vector<8x3xf32> to vector<8x1xf32>
    %4 = vector.extract_strided_slice %1 {offsets = [0, 2], sizes = [8, 1], strides = [1, 1]} : vector<8x3xf32> to vector<8x1xf32>
    %5 = vector.broadcast %3 : vector<8x1xf32> to vector<8x256xf32>
    %6 = arith.mulf %0, %5 : vector<8x256xf32>
    %7 = vector.broadcast %4 : vector<8x1xf32> to vector<8x256xf32>
    %8 = arith.subf %6, %7 : vector<8x256xf32>
    %9 = math.roundeven %8 : vector<8x256xf32>
    %cst = arith.constant -1.280000e+02 : f32
    %cst_3 = arith.constant 1.270000e+02 : f32
    %10 = vector.broadcast %cst : f32 to vector<8x256xf32>
    %11 = arith.maximumf %10, %9 : vector<8x256xf32>
    %12 = vector.broadcast %cst_3 : f32 to vector<8x256xf32>
    %13 = arith.minimumf %12, %11 : vector<8x256xf32>
    %14 = vector.broadcast %4 : vector<8x1xf32> to vector<8x256xf32>
    %15 = arith.addf %13, %14 : vector<8x256xf32>
    %16 = vector.broadcast %2 : vector<8x1xf32> to vector<8x256xf32>
    %17 = arith.mulf %15, %16 : vector<8x256xf32>
    %c0_4 = arith.constant 0 : index
    %c0_5 = arith.constant 0 : index
    %18 = vector.load %arg4[%c0_4, %c0_5] : memref<8x256xf32, #tpu.memory_space<vmem>>, vector<8x256xf32>
    tpu.vector_store %arg4[%c0_4, %c0_5], %17 {strides = array<i32>} : memref<8x256xf32, #tpu.memory_space<vmem>>, vector<8x256xf32>,
    return
  }
  func.func @transform_0(%arg0: i32, %arg1: i32) -> (i32, i32) {
    %c0_i32 = arith.constant 0 : i32
    return %arg0, %arg1 : i32, i32
  }
  func.func @transform_1(%arg0: i32, %arg1: i32) -> (i32, i32) {
    %c0_i32 = arith.constant 0 : i32
    %c0_i32_0 = arith.constant 0 : i32
    return %arg0, %c0_i32 : i32, i32
  }
  func.func @transform_2(%arg0: i32, %arg1: i32) -> (i32, i32) {
    %c0_i32 = arith.constant 0 : i32
    return %arg0, %arg1 : i32, i32
  }
}

</mosaic_0001>

<bundles_post_ra>
// kernel: tpu_custom_call.1
= control target key start
LH: loop header
LB: loop body
LE: loop exit
PB: predicated region body
PF: predicated region fallthrough
CT: control target
= control target key end

     0   :  { %7 = vsyncpa [#allocation3], 0  ;;  %s177_s0 = inlined_call_operand.hbm [shape: f32[8,256], index: 0, kind: input, shape index: {}]   ;;  %s178_s1 = inlined_call_operand.vmem [shape: f32[8,3], index: 1, kind: input, shape index: {}]   ;;  %s179_s2 = inlined_call_operand.hbm [shape: f32[8,256], index: 2, kind: output, shape index: {}]  }
   0x1   :  { %8 = vsyncpa [#allocation4], 0  ;;  %s130_s9 = smov [#allocation2]   ;;  %s82_s13 = scalar_lea.hbm %s177_s0, 256 }
   0x2   :  { %s15_s10 = sshll.u32 %s130_s9, 4  ;;  %p83_p0 = scmp.ne.s32.totalorder %s177_s0, %s82_s13  ;;  %s16_s10 = int_to_ptr.vmem [resolvable:$true] %s15_s10 }
   0x3   :  { %p86_p1 = scmp.lt.u32.totalorder %s82_s13, %s177_s0 }
   0x5   :  { %p88_p2 = pnand %p86_p1, %p83_p0 }
   0x7   :  { %91 = shalt.err (!%p88_p2)
}
   0x8   :  { %s92_s18 = scalar_lea.vmem %s16_s10, 256  ;;  %p97_p4 = scmp.lt.s32.totalorder %s16_s10, %s16_s10 }
   0x9   :  { %p93_p3 = scmp.ne.s32.totalorder %s16_s10, %s92_s18  ;;  %p98_p5 = scmp.lt.s32.totalorder %s92_s18, %s92_s18 }
   0xb   :  { %p99_p6 = por %p98_p5, %p97_p4 }
   0xd   :  { %p100_p7 = pnand %p99_p6, %p93_p3 }
   0xf   :  { %103 = shalt.err (!%p100_p7)
}
  0x10   :  { %18 = dma.hbm_to_vmem [thread:$0]  %s177_s0, 256, %s16_s10, [#allocation3]  }
  0x11   :  { %126 = dma.done.wait [#allocation3], 256  }
  0x12   :  { %127 = vsyncadd [#allocation3], 4294967040  ;;  %v131_v0 = vmov 1   ;;  %v132_v1 = vmov 0   ;;  %v26_v2 = vld [vmem:[%s178_s1] sm:$0xff]  ;;  %v133_v3 = vmov 2  }
  0x13   :  { %78 = vset.pattern.permute.xlu0 %v131_v0  ;;  %80 = vset.pattern.permute.xlu1 %v132_v1  ;;  %v24_v5 = vld [vmem:[#allocation2] sm:$0xff]  ;;  %v25_v6 = vld [vmem:[#allocation2 + $0x8] sm:$0xff]  ;;  %s134_s0 = smov [#allocation5]  }
  0x14   :  { %29 = vperm.xlu0 %78, %v26_v2   ;;  %49 = vperm.xlu1 %80, %v26_v2   ;;  %s62_s1 = sshll.u32 %s134_s0, 4  ;;  %s63_s1 = int_to_ptr.vmem [resolvable:$true] %s62_s1 }
  0x15   :  { %s104_s23 = scalar_lea.vmem %s63_s1, 256  ;;  %p109_p9 = scmp.lt.s32.totalorder %s63_s1, %s63_s1 }
  0x16   :  { %p105_p8 = scmp.ne.s32.totalorder %s63_s1, %s104_s23  ;;  %p110_p10 = scmp.lt.s32.totalorder %s104_s23, %s104_s23 }
  0x18   :  { %79 = vset.pattern.permute.xlu0 %v133_v3  ;;  %p111_p11 = por %p110_p10, %p109_p9 }
  0x19   :  { %35 = vperm.xlu0 %79, %v26_v2  }
  0x1a   :  { %p112_p12 = pnand %p111_p11, %p105_p8 }
  0x1d   :  { %81 = vset.pattern.permute.xlu0 %v132_v1 }
  0x93   :  { %v30_v4 = vpop.permute.xlu0 %29  ;;  %v50_v18 = vpop.permute.xlu1 %49 }
  0x94   :  { %v32_v7 = vmul.f32 %v30_v4, %v24_v5  ;;  %v33_v8 = vmul.f32 %v30_v4, %v25_v6 }
  0x98   :  { %v36_v9 = vpop.permute.xlu0 %35 }
  0x99   :  { %v38_v10 = vsub.f32 %v32_v7, %v36_v9  ;;  %v39_v11 = vsub.f32 %v33_v8, %v36_v9 }
  0x9b   :  { %v71_v12 = vround.rtne.f32 %v38_v10  ;;  %v72_v13 = vround.rtne.f32 %v39_v11 }
  0x9d   :  { %v42_v14 = vmax.f32 %v71_v12, -128.0  ;;  %v43_v15 = vmax.f32 %v72_v13, -128.0 }
  0x9f   :  { %v44_v16 = vmin.f32 %v42_v14, 127.0  ;;  %v45_v17 = vmin.f32 %v43_v15, 127.0 }
  0xa1   :  { %v46_v19 = vadd.f32 %v44_v16, %v36_v9  ;;  %v47_v20 = vadd.f32 %v45_v17, %v36_v9 }
  0xa3   :  { %v52_v21 = vmul.f32 %v50_v18, %v46_v19  ;;  %v53_v22 = vmul.f32 %v50_v18, %v47_v20 }
  0xa5   :  { %54 = vst [vmem:[#allocation5] sm:$0xff] %v52_v21  ;;  %55 = vst [vmem:[#allocation5 + $0x8] sm:$0xff] %v53_v22 }
  0xa6   :  { %115 = shalt.err (!%p112_p12)
}
  0xa7   :  { %s116_s26 = scalar_lea.hbm %s179_s2, 256 }
  0xa8   :  { %p117_p13 = scmp.ne.s32.totalorder %s179_s2, %s116_s26  ;;  %p120_p0 = scmp.lt.u32.totalorder %s116_s26, %s179_s2 }
  0xaa   :  { %p122_p1 = pnand %p120_p0, %p117_p13 }
  0xac   :  { %125 = shalt.err (!%p122_p1)
}
  0xad   :  { %65 = dma.vmem_to_hbm [thread:$0]  %s63_s1, 256, %s179_s2, [#allocation4]  }
  0xae   :  { %128 = dma.done.wait [#allocation4], 256  }
  0xaf   :  { %129 = vsyncadd [#allocation4], 4294967040 }
  0xb0   :  { %69 = vsyncpa [#allocation3], 1 }
  0xb1   :  { %70 = vsyncpa [#allocation4], 1 }

</bundles_post_ra>
